<compile_context>
chip_gen: v5e
topology: v5e:2x2
jax: 0.10.0
libtpu: 0.0.40
codegen_flags: <defaults>
</compile_context>

<pallas_src>
import functools

import jax
import jax.numpy as jnp
from jax import lax
from jax.experimental import pallas as pl
from jax.experimental.pallas import tpu as pltpu


# ----------------------------- Pallas kernel --------------------------------
def _conv_bn_relu_kernel(x_ref, w_ref, b_ref, o_ref, *, width, kh, kw):
    # x_ref: (1, Cin, L)        bf16 flattened, halo-padded activations
    # w_ref: (kh*kw, Cout, Cin) bf16 per-tap weight matrices, BN scale folded in
    # b_ref: (Cout, 1)          f32 folded BN bias
    # o_ref: (1, Cout, H*W)     f32 lane-dense output tile
    cin = x_ref.shape[1]
    cout, hw = o_ref.shape[1], o_ref.shape[2]
    pw = kw // 2

    # Lane-index -> image column, used to mask horizontal taps at the image
    # border.  Computed once (JAX does not CSE broadcast_in_dim -> keep hoisted).
    col = lax.broadcasted_iota(jnp.int32, (cin, hw), 1) % width
    keep = {}
    for d in sorted({j - pw for j in range(kw)}):
        if d != 0:
            keep[d] = ((col + d >= 0) & (col + d < width)).astype(x_ref.dtype)

    # Conv as kh*kw shifted, accumulating MXU matmuls.  No VLIW slot is near
    # saturation at Cout=8 / Cin=4; the binding cost is per-call overhead and
    # DMA issue latency, so the body is kept simple (no further micro-opts).
    acc = jnp.zeros((cout, hw), jnp.float32)
    for i in range(kh):
        for j in range(kw):
            xs = x_ref[0, :, pl.ds(i * width + j, hw)]      # (Cin, H*W) bf16
            d = j - pw
            if d != 0:
                xs = xs * keep[d]                           # zero invalid cols
            acc += jnp.dot(w_ref[i * kw + j], xs,
                           preferred_element_type=jnp.float32)

    # Epilogue: folded-BN bias + ReLU in f32, single lane-dense store.
    o_ref[0] = jnp.maximum(acc + b_ref[...], 0.0).astype(o_ref.dtype)


def _fused_conv_bn_relu(xf, w_taps, bias_col, *, n, cout, hw, width, kh, kw):
    cin, L = xf.shape[1], xf.shape[2]
    return pl.pallas_call(
        functools.partial(_conv_bn_relu_kernel, width=width, kh=kh, kw=kw),
        out_shape=jax.ShapeDtypeStruct((n, cout, hw), jnp.float32),
        grid_spec=pltpu.PrefetchScalarGridSpec(
            num_scalar_prefetch=0,
            grid=(n,),                      # one image per step: v7x's 2 TCs both
                                            # busy; 2 cheap steps on v5e/v6e.
            in_specs=[
                pl.BlockSpec((1, cin, L), lambda i: (i, 0, 0)),
                # Constant index_maps: weights / bias stay resident in VMEM.
                pl.BlockSpec((kh * kw, cout, cin), lambda i: (0, 0, 0)),
                pl.BlockSpec((cout, 1), lambda i: (0, 0)),
            ],
            out_specs=pl.BlockSpec((1, cout, hw), lambda i: (i, 0, 0)),
        ),
        compiler_params=pltpu.CompilerParams(
            dimension_semantics=("parallel",)),
    )(xf, w_taps, bias_col)


# ------------------------------- glue (JAX) ----------------------------------
@functools.partial(jax.jit, static_argnames=("eps",))
def basic_conv2d_forward(x, weight, gamma, beta, running_mean, running_var,
                         eps=0.001):
    """Conv2d(bias=False, stride=1, 'same' odd kernel) + BatchNorm2d(eval) + ReLU."""
    N, Cin, H, W = x.shape
    Cout, _, kh, kw = weight.shape
    ph, pw = kh // 2, kw // 2
    HW = H * W

    # Fold inference BatchNorm into the conv: scale into the weights, leaving a
    # per-channel bias for the kernel epilogue.
    scale = gamma / jnp.sqrt(running_var + eps)                   # [Cout]
    bias = beta - running_mean * scale                            # [Cout]
    w_taps = jnp.transpose(weight * scale[:, None, None, None],
                           (2, 3, 0, 1))                          # [kh,kw,Cout,Cin]
    w_taps = w_taps.reshape(kh * kw, Cout, Cin).astype(jnp.bfloat16)

    # Flattened, halo-padded activation slab (bf16 cast BEFORE any expansion).
    # Vertical halo = explicit zero rows (kept contiguous by the flattening);
    # horizontal halo = in-kernel lane mask, so the kernel output already has
    # the final contiguous (N, Cout, H, W) element order.
    L = pl.cdiv(HW + (kh - 1) * W + kw - 1, 128) * 128            # lane-friendly
    xf = jnp.pad(x.astype(jnp.bfloat16),
                 ((0, 0), (0, 0), (ph, ph), (0, 0)))              # [N,Cin,H+2ph,W]
    xf = xf.reshape(N, Cin, (H + 2 * ph) * W)
    xf = jnp.pad(xf, ((0, 0), (0, 0), (pw, L - pw - (H + 2 * ph) * W)))

    out = _fused_conv_bn_relu(
        xf, w_taps, bias.reshape(Cout, 1).astype(jnp.float32),
        n=N, cout=Cout, hw=HW, width=W, kh=kh, kw=kw)             # [N,Cout,H*W]
    return out.reshape(N, Cout, H, W)                             # free (contiguous)


# --------------------------------- main --------------------------------------
if __name__ == "__main__":
    # Module config: BasicConv2d(in_channels=4, out_channels=8,
    #                            kernel_size=3, padding=1)
    N, Cin, H, W = 2, 4, 16, 16
    Cout, kh, kw = 8, 3, 3

    key = jax.random.PRNGKey(0)
    kx, kw_, km, kv = jax.random.split(key, 4)

    x = jax.random.normal(kx, (N, Cin, H, W), dtype=jnp.float32)
    weight = 0.1 * jax.random.normal(kw_, (Cout, Cin, kh, kw), dtype=jnp.float32)

    # Deterministic (non-trivial) BatchNorm parameters / running statistics.
    # TODO(synk): PyTorch default is training-mode BN (batch stats + running-stat
    # update); this kernel implements inference-mode (eval) semantics.
    gamma = jnp.linspace(0.5, 1.5, Cout, dtype=jnp.float32)
    beta = jnp.linspace(-0.2, 0.2, Cout, dtype=jnp.float32)
    running_mean = 0.1 * jax.random.normal(km, (Cout,), dtype=jnp.float32)
    running_var = 1.0 + 0.1 * jnp.abs(
        jax.random.normal(kv, (Cout,), dtype=jnp.float32))

    out = basic_conv2d_forward(x, weight, gamma, beta, running_mean, running_var)
    out = jax.block_until_ready(out)

    # Pure-JAX f32 reference (kernel uses bf16 MXU operands -> loose tolerance;
    # accumulation / epilogue stay f32).
    conv_ref = lax.conv_general_dilated(
        x, weight, window_strides=(1, 1), padding=((1, 1), (1, 1)),
        dimension_numbers=("NCHW", "OIHW", "NCHW"))
    s = (gamma / jnp.sqrt(running_var + 0.001)).reshape(1, Cout, 1, 1)
    b = (beta - running_mean * gamma / jnp.sqrt(running_var + 0.001)).reshape(
        1, Cout, 1, 1)
    ref = jnp.maximum(conv_ref * s + b, 0.0)

    assert out.shape == (N, Cout, H, W)
    assert jnp.allclose(out, ref, atol=3e-2, rtol=3e-2), (
        float(jnp.max(jnp.abs(out - ref))))

    print("KERNEL_OK")
</pallas_src>

<mosaic_0001>
module attributes {stable_mosaic.version = 11 : i64} {
  func.func @_conv_bn_relu_kernel(%arg0: i32, %arg1: memref<1x4x384xbf16, #tpu.memory_space<vmem>>, %arg2: memref<9x8x4xbf16, #tpu.memory_space<vmem>>, %arg3: memref<8x1xf32, #tpu.memory_space<vmem>>, %arg4: memref<1x8x256xf32, #tpu.memory_space<vmem>>) attributes {dimension_semantics = [#tpu.dimension_semantics<parallel>], iteration_bounds = array<i64: 2>, scalar_prefetch = 0 : i64, scratch_operands = 0 : i64, tpu.core_type = #tpu.core_type<tc>, window_params = [{transform_indices = @transform_0, window_bounds = array<i64: 1, 4, 384>}, {pipeline_mode = #tpu.pipeline_mode<synchronous>, transform_indices = @transform_1, window_bounds = array<i64: 9, 8, 4>}, {pipeline_mode = #tpu.pipeline_mode<synchronous>, transform_indices = @transform_2, window_bounds = array<i64: 8, 1>}, {transform_indices = @transform_3, window_bounds = array<i64: 1, 8, 256>}]} {
    %0 = tpu.iota {dimensions = array<i32: 1>} : vector<4x256xi32>
    %c16_i32 = arith.constant 16 : i32
    %c0_i32 = arith.constant 0 : i32
    %1 = arith.cmpi eq, %c16_i32, %c0_i32 : i32
    %c1_i32 = arith.constant 1 : i32
    %2 = arith.select %1, %c1_i32, %c16_i32 : i32
    %3 = vector.broadcast %2 : i32 to vector<4x256xi32>
    %4 = arith.remsi %0, %3 : vector<4x256xi32>
    %c0_i32_0 = arith.constant 0 : i32
    %5 = vector.broadcast %c0_i32_0 : i32 to vector<4x256xi32>
    %6 = arith.cmpi ne, %4, %5 : vector<4x256xi32>
    %c0_i32_1 = arith.constant 0 : i32
    %7 = vector.broadcast %c0_i32_1 : i32 to vector<4x256xi32>
    %8 = arith.cmpi slt, %4, %7 : vector<4x256xi32>
    %c0_i32_2 = arith.constant 0 : i32
    %9 = arith.cmpi slt, %2, %c0_i32_2 : i32
    %10 = vector.broadcast %9 : i1 to vector<4x256xi1>
    %11 = vector.broadcast %10 : vector<4x256xi1> to vector<4x256xi1>
    %12 = arith.xori %8, %11 : vector<4x256xi1>
    %13 = arith.andi %12, %6 : vector<4x256xi1>
    %14 = vector.broadcast %2 : i32 to vector<4x256xi32>
    %15 = arith.addi %4, %14 : vector<4x256xi32>
    %16 = arith.select %13, %15, %4 : vector<4x256xi1>, vector<4x256xi32>
    %c-1_i32 = arith.constant -1 : i32
    %17 = vector.broadcast %c-1_i32 : i32 to vector<4x256xi32>
    %18 = arith.addi %16, %17 : vector<4x256xi32>
    %c0_i32_3 = arith.constant 0 : i32
    %19 = vector.broadcast %c0_i32_3 : i32 to vector<4x256xi32>
    %20 = arith.cmpi sge, %18, %19 : vector<4x256xi32>
    %c-1_i32_4 = arith.constant -1 : i32
    %21 = vector.broadcast %c-1_i32_4 : i32 to vector<4x256xi32>
    %22 = arith.addi %16, %21 : vector<4x256xi32>
    %c16_i32_5 = arith.constant 16 : i32
    %23 = vector.broadcast %c16_i32_5 : i32 to vector<4x256xi32>
    %24 = arith.cmpi slt, %22, %23 : vector<4x256xi32>
    %25 = arith.andi %20, %24 : vector<4x256xi1>
    %26 = arith.extui %25 : vector<4x256xi1> to vector<4x256xi32>
    %27 = arith.sitofp %26 : vector<4x256xi32> to vector<4x256xf32>
    %28 = arith.truncf %27 : vector<4x256xf32> to vector<4x256xbf16>
    %c1_i32_6 = arith.constant 1 : i32
    %29 = vector.broadcast %c1_i32_6 : i32 to vector<4x256xi32>
    %30 = arith.addi %16, %29 : vector<4x256xi32>
    %c0_i32_7 = arith.constant 0 : i32
    %31 = vector.broadcast %c0_i32_7 : i32 to vector<4x256xi32>
    %32 = arith.cmpi sge, %30, %31 : vector<4x256xi32>
    %c1_i32_8 = arith.constant 1 : i32
    %33 = vector.broadcast %c1_i32_8 : i32 to vector<4x256xi32>
    %34 = arith.addi %16, %33 : vector<4x256xi32>
    %c16_i32_9 = arith.constant 16 : i32
    %35 = vector.broadcast %c16_i32_9 : i32 to vector<4x256xi32>
    %36 = arith.cmpi slt, %34, %35 : vector<4x256xi32>
    %37 = arith.andi %32, %36 : vector<4x256xi1>
    %38 = arith.extui %37 : vector<4x256xi1> to vector<4x256xi32>
    %39 = arith.sitofp %38 : vector<4x256xi32> to vector<4x256xf32>
    %40 = arith.truncf %39 : vector<4x256xf32> to vector<4x256xbf16>
    %cst = arith.constant 0.000000e+00 : f32
    %41 = vector.broadcast %cst : f32 to vector<8x256xf32>
    %c0 = arith.constant 0 : index
    %c0_10 = arith.constant 0 : index
    %c0_11 = arith.constant 0 : index
    %42 = vector.load %arg1[%c0, %c0_10, %c0_11] : memref<1x4x384xbf16, #tpu.memory_space<vmem>>, vector<1x4x256xbf16>
    %43 = vector.shape_cast %42 : vector<1x4x256xbf16> to vector<4x256xbf16>
    %44 = arith.mulf %43, %28 : vector<4x256xbf16>
    %c0_12 = arith.constant 0 : index
    %c0_13 = arith.constant 0 : index
    %c0_14 = arith.constant 0 : index
    %45 = vector.load %arg2[%c0_12, %c0_13, %c0_14] : memref<9x8x4xbf16, #tpu.memory_space<vmem>>, vector<1x8x4xbf16>
    %46 = vector.shape_cast %45 : vector<1x8x4xbf16> to vector<8x4xbf16>
    %cst_15 = arith.constant dense<0.000000e+00> : vector<8x256xf32>
    %47 = tpu.matmul %46, %44, %cst_15 {dimension_numbers = #tpu.dot_dimension_numbers<[1], [0], [0], [1], [0, 0, 1, 1], [], []>} : vector<8x4xbf16>, vector<4x256xbf16>, vector<8x256xf32> -> vector<8x256xf32>
    %48 = arith.addf %41, %47 : vector<8x256xf32>
    %c0_16 = arith.constant 0 : index
    %c0_17 = arith.constant 0 : index
    %c1 = arith.constant 1 : index
    %49 = vector.load %arg1[%c0_16, %c0_17, %c1] : memref<1x4x384xbf16, #tpu.memory_space<vmem>>, vector<1x4x256xbf16>
    %50 = vector.shape_cast %49 : vector<1x4x256xbf16> to vector<4x256xbf16>
    %c1_18 = arith.constant 1 : index
    %c0_19 = arith.constant 0 : index
    %c0_20 = arith.constant 0 : index
    %51 = vector.load %arg2[%c1_18, %c0_19, %c0_20] : memref<9x8x4xbf16, #tpu.memory_space<vmem>>, vector<1x8x4xbf16>
    %52 = vector.shape_cast %51 : vector<1x8x4xbf16> to vector<8x4xbf16>
    %cst_21 = arith.constant dense<0.000000e+00> : vector<8x256xf32>
    %53 = tpu.matmul %52, %50, %cst_21 {dimension_numbers = #tpu.dot_dimension_numbers<[1], [0], [0], [1], [0, 0, 1, 1], [], []>} : vector<8x4xbf16>, vector<4x256xbf16>, vector<8x256xf32> -> vector<8x256xf32>
    %54 = arith.addf %48, %53 : vector<8x256xf32>
    %c0_22 = arith.constant 0 : index
    %c0_23 = arith.constant 0 : index
    %c2 = arith.constant 2 : index
    %55 = vector.load %arg1[%c0_22, %c0_23, %c2] : memref<1x4x384xbf16, #tpu.memory_space<vmem>>, vector<1x4x256xbf16>
    %56 = vector.shape_cast %55 : vector<1x4x256xbf16> to vector<4x256xbf16>
    %57 = arith.mulf %56, %40 : vector<4x256xbf16>
    %c2_24 = arith.constant 2 : index
    %c0_25 = arith.constant 0 : index
    %c0_26 = arith.constant 0 : index
    %58 = vector.load %arg2[%c2_24, %c0_25, %c0_26] : memref<9x8x4xbf16, #tpu.memory_space<vmem>>, vector<1x8x4xbf16>
    %59 = vector.shape_cast %58 : vector<1x8x4xbf16> to vector<8x4xbf16>
    %cst_27 = arith.constant dense<0.000000e+00> : vector<8x256xf32>
    %60 = tpu.matmul %59, %57, %cst_27 {dimension_numbers = #tpu.dot_dimension_numbers<[1], [0], [0], [1], [0, 0, 1, 1], [], []>} : vector<8x4xbf16>, vector<4x256xbf16>, vector<8x256xf32> -> vector<8x256xf32>
    %61 = arith.addf %54, %60 : vector<8x256xf32>
    %c0_28 = arith.constant 0 : index
    %c0_29 = arith.constant 0 : index
    %c16 = arith.constant 16 : index
    %62 = vector.load %arg1[%c0_28, %c0_29, %c16] : memref<1x4x384xbf16, #tpu.memory_space<vmem>>, vector<1x4x256xbf16>
    %63 = vector.shape_cast %62 : vector<1x4x256xbf16> to vector<4x256xbf16>
    %64 = arith.mulf %63, %28 : vector<4x256xbf16>
    %c3 = arith.constant 3 : index
    %c0_30 = arith.constant 0 : index
    %c0_31 = arith.constant 0 : index
    %65 = vector.load %arg2[%c3, %c0_30, %c0_31] : memref<9x8x4xbf16, #tpu.memory_space<vmem>>, vector<1x8x4xbf16>
    %66 = vector.shape_cast %65 : vector<1x8x4xbf16> to vector<8x4xbf16>
    %cst_32 = arith.constant dense<0.000000e+00> : vector<8x256xf32>
    %67 = tpu.matmul %66, %64, %cst_32 {dimension_numbers = #tpu.dot_dimension_numbers<[1], [0], [0], [1], [0, 0, 1, 1], [], []>} : vector<8x4xbf16>, vector<4x256xbf16>, vector<8x256xf32> -> vector<8x256xf32>
    %68 = arith.addf %61, %67 : vector<8x256xf32>
    %c0_33 = arith.constant 0 : index
    %c0_34 = arith.constant 0 : index
    %c17 = arith.constant 17 : index
    %69 = vector.load %arg1[%c0_33, %c0_34, %c17] : memref<1x4x384xbf16, #tpu.memory_space<vmem>>, vector<1x4x256xbf16>
    %70 = vector.shape_cast %69 : vector<1x4x256xbf16> to vector<4x256xbf16>
    %c4 = arith.constant 4 : index
    %c0_35 = arith.constant 0 : index
    %c0_36 = arith.constant 0 : index
    %71 = vector.load %arg2[%c4, %c0_35, %c0_36] : memref<9x8x4xbf16, #tpu.memory_space<vmem>>, vector<1x8x4xbf16>
    %72 = vector.shape_cast %71 : vector<1x8x4xbf16> to vector<8x4xbf16>
    %cst_37 = arith.constant dense<0.000000e+00> : vector<8x256xf32>
    %73 = tpu.matmul %72, %70, %cst_37 {dimension_numbers = #tpu.dot_dimension_numbers<[1], [0], [0], [1], [0, 0, 1, 1], [], []>} : vector<8x4xbf16>, vector<4x256xbf16>, vector<8x256xf32> -> vector<8x256xf32>
    %74 = arith.addf %68, %73 : vector<8x256xf32>
    %c0_38 = arith.constant 0 : index
    %c0_39 = arith.constant 0 : index
    %c18 = arith.constant 18 : index
    %75 = vector.load %arg1[%c0_38, %c0_39, %c18] : memref<1x4x384xbf16, #tpu.memory_space<vmem>>, vector<1x4x256xbf16>
    %76 = vector.shape_cast %75 : vector<1x4x256xbf16> to vector<4x256xbf16>
    %77 = arith.mulf %76, %40 : vector<4x256xbf16>
    %c5 = arith.constant 5 : index
    %c0_40 = arith.constant 0 : index
    %c0_41 = arith.constant 0 : index
    %78 = vector.load %arg2[%c5, %c0_40, %c0_41] : memref<9x8x4xbf16, #tpu.memory_space<vmem>>, vector<1x8x4xbf16>
    %79 = vector.shape_cast %78 : vector<1x8x4xbf16> to vector<8x4xbf16>
    %cst_42 = arith.constant dense<0.000000e+00> : vector<8x256xf32>
    %80 = tpu.matmul %79, %77, %cst_42 {dimension_numbers = #tpu.dot_dimension_numbers<[1], [0], [0], [1], [0, 0, 1, 1], [], []>} : vector<8x4xbf16>, vector<4x256xbf16>, vector<8x256xf32> -> vector<8x256xf32>
    %81 = arith.addf %74, %80 : vector<8x256xf32>
    %c0_43 = arith.constant 0 : index
    %c0_44 = arith.constant 0 : index
    %c32 = arith.constant 32 : index
    %82 = vector.load %arg1[%c0_43, %c0_44, %c32] : memref<1x4x384xbf16, #tpu.memory_space<vmem>>, vector<1x4x256xbf16>
    %83 = vector.shape_cast %82 : vector<1x4x256xbf16> to vector<4x256xbf16>
    %84 = arith.mulf %83, %28 : vector<4x256xbf16>
    %c6 = arith.constant 6 : index
    %c0_45 = arith.constant 0 : index
    %c0_46 = arith.constant 0 : index
    %85 = vector.load %arg2[%c6, %c0_45, %c0_46] : memref<9x8x4xbf16, #tpu.memory_space<vmem>>, vector<1x8x4xbf16>
    %86 = vector.shape_cast %85 : vector<1x8x4xbf16> to vector<8x4xbf16>
    %cst_47 = arith.constant dense<0.000000e+00> : vector<8x256xf32>
    %87 = tpu.matmul %86, %84, %cst_47 {dimension_numbers = #tpu.dot_dimension_numbers<[1], [0], [0], [1], [0, 0, 1, 1], [], []>} : vector<8x4xbf16>, vector<4x256xbf16>, vector<8x256xf32> -> vector<8x256xf32>
    %88 = arith.addf %81, %87 : vector<8x256xf32>
    %c0_48 = arith.constant 0 : index
    %c0_49 = arith.constant 0 : index
    %c33 = arith.constant 33 : index
    %89 = vector.load %arg1[%c0_48, %c0_49, %c33] : memref<1x4x384xbf16, #tpu.memory_space<vmem>>, vector<1x4x256xbf16>
    %90 = vector.shape_cast %89 : vector<1x4x256xbf16> to vector<4x256xbf16>
    %c7 = arith.constant 7 : index
    %c0_50 = arith.constant 0 : index
    %c0_51 = arith.constant 0 : index
    %91 = vector.load %arg2[%c7, %c0_50, %c0_51] : memref<9x8x4xbf16, #tpu.memory_space<vmem>>, vector<1x8x4xbf16>
    %92 = vector.shape_cast %91 : vector<1x8x4xbf16> to vector<8x4xbf16>
    %cst_52 = arith.constant dense<0.000000e+00> : vector<8x256xf32>
    %93 = tpu.matmul %92, %90, %cst_52 {dimension_numbers = #tpu.dot_dimension_numbers<[1], [0], [0], [1], [0, 0, 1, 1], [], []>} : vector<8x4xbf16>, vector<4x256xbf16>, vector<8x256xf32> -> vector<8x256xf32>
    %94 = arith.addf %88, %93 : vector<8x256xf32>
    %c0_53 = arith.constant 0 : index
    %c0_54 = arith.constant 0 : index
    %c34 = arith.constant 34 : index
    %95 = vector.load %arg1[%c0_53, %c0_54, %c34] : memref<1x4x384xbf16, #tpu.memory_space<vmem>>, vector<1x4x256xbf16>
    %96 = vector.shape_cast %95 : vector<1x4x256xbf16> to vector<4x256xbf16>
    %97 = arith.mulf %96, %40 : vector<4x256xbf16>
    %c8 = arith.constant 8 : index
    %c0_55 = arith.constant 0 : index
    %c0_56 = arith.constant 0 : index
    %98 = vector.load %arg2[%c8, %c0_55, %c0_56] : memref<9x8x4xbf16, #tpu.memory_space<vmem>>, vector<1x8x4xbf16>
    %99 = vector.shape_cast %98 : vector<1x8x4xbf16> to vector<8x4xbf16>
    %cst_57 = arith.constant dense<0.000000e+00> : vector<8x256xf32>
    %100 = tpu.matmul %99, %97, %cst_57 {dimension_numbers = #tpu.dot_dimension_numbers<[1], [0], [0], [1], [0, 0, 1, 1], [], []>} : vector<8x4xbf16>, vector<4x256xbf16>, vector<8x256xf32> -> vector<8x256xf32>
    %101 = arith.addf %94, %100 : vector<8x256xf32>
    %c0_58 = arith.constant 0 : index
    %c0_59 = arith.constant 0 : index
    %102 = vector.load %arg3[%c0_58, %c0_59] : memref<8x1xf32, #tpu.memory_space<vmem>>, vector<8x1xf32>
    %103 = vector.broadcast %102 : vector<8x1xf32> to vector<8x256xf32>
    %104 = arith.addf %101, %103 : vector<8x256xf32>
    %cst_60 = arith.constant 0.000000e+00 : f32
    %105 = vector.broadcast %cst_60 : f32 to vector<8x256xf32>
    %106 = arith.maximumf %104, %105 : vector<8x256xf32>
    %c0_61 = arith.constant 0 : index
    %c0_62 = arith.constant 0 : index
    %c0_63 = arith.constant 0 : index
    %107 = vector.load %arg4[%c0_61, %c0_62, %c0_63] : memref<1x8x256xf32, #tpu.memory_space<vmem>>, vector<1x8x256xf32>
    %108 = vector.shape_cast %107 : vector<1x8x256xf32> to vector<8x256xf32>
    %109 = vector.shape_cast %106 : vector<8x256xf32> to vector<1x8x256xf32>
    tpu.vector_store %arg4[%c0_61, %c0_62, %c0_63], %109 {strides = array<i32>} : memref<1x8x256xf32, #tpu.memory_space<vmem>>, vector<1x8x256xf32>,
    return
  }
  func.func @transform_0(%arg0: i32) -> (i32, i32, i32) {
    %c0_i32 = arith.constant 0 : i32
    %c0_i32_0 = arith.constant 0 : i32
    %c0_i32_1 = arith.constant 0 : i32
    return %arg0, %c0_i32, %c0_i32_0 : i32, i32, i32
  }
  func.func @transform_1(%arg0: i32) -> (i32, i32, i32) {
    %c0_i32 = arith.constant 0 : i32
    %c0_i32_0 = arith.constant 0 : i32
    %c0_i32_1 = arith.constant 0 : i32
    %c0_i32_2 = arith.constant 0 : i32
    return %c0_i32, %c0_i32_0, %c0_i32_1 : i32, i32, i32
  }
  func.func @transform_2(%arg0: i32) -> (i32, i32) {
    %c0_i32 = arith.constant 0 : i32
    %c0_i32_0 = arith.constant 0 : i32
    %c0_i32_1 = arith.constant 0 : i32
    return %c0_i32, %c0_i32_0 : i32, i32
  }
  func.func @transform_3(%arg0: i32) -> (i32, i32, i32) {
    %c0_i32 = arith.constant 0 : i32
    %c0_i32_0 = arith.constant 0 : i32
    %c0_i32_1 = arith.constant 0 : i32
    return %arg0, %c0_i32, %c0_i32_0 : i32, i32, i32
  }
}

</mosaic_0001>

<bundles_post_ra>
// kernel: basic_conv2d_forward.1
= control target key start
LH: loop header
LB: loop body
LE: loop exit
PB: predicated region body
PF: predicated region fallthrough
CT: control target
= control target key end

     0   :  { %s1019_s12 = smov 0   ;;  %s1125_s0 = inlined_call_operand.vmem [shape: bf16[2,4,384], index: 0, kind: input, shape index: {}]   ;;  %s1126_s1 = inlined_call_operand.vmem [shape: bf16[9,8,4], index: 1, kind: input, shape index: {}]   ;;  %s1127_s2 = inlined_call_operand.vmem [shape: f32[8,1], index: 2, kind: input, shape index: {}]   ;;  %s1128_s3 = inlined_call_operand.vmem [shape: f32[2,8,256], index: 3, kind: output, shape index: {}]  }
   0x1 LB: > { %s909_s13 = sadd.s32 4294967295, %s982_s12   ;;  %p913_p0 = scmp.ge.s32.totalorder %s982_s12, 1  ;;  %s982_s12 = sphi %s1019_s12, %s13_s12  }
   0x2   : > { %p137_p1 = scmp.lt.s32.totalorder %s982_s12, 3 }
   0x4   : > { %p138_p2 = pnand %p913_p0, %p137_p1 }
   0x5   : > { %p161_p3 = scmp.lt.s32.totalorder (!%p138_p2), %s909_s13, 1  ;;  %s985_s18 = smov (!%p138_p2), 2  }
   0x6   : > { %141 = sbr.rel (%p138_p2) target bundleno = 462 (0x1ce), region = 32  ;;  %s986_s19 = smov (!%p138_p2), 18  }
   0x7   : > { %s987_s20 = smov (!%p138_p2), 16   ;;  %s988_s21 = smov (!%p138_p2), 32  }
   0x8   : > { %s989_s22 = smov (!%p138_p2), 34   ;;  %s990_s23 = smov (!%p138_p2), 127  }
   0x9   : > { %s991_s24 = smov (!%p138_p2), 126   ;;  %s992_s25 = smov (!%p138_p2), 112  }
   0xa   : > { %s993_s26 = smov (!%p138_p2), 111   ;;  %s994_s27 = smov (!%p138_p2), 110  }
   0xb   : > { %v172_v0 = vlaneseq  ;;  %s1130_s13 = smov (!%p161_p3, %s909_s13), 1  ;;  %v984_v10 = vmov 0.0   ;;  %vm232_vm3 = vcmask 1043456   ;;  %vm349_vm5 = vcmask 15360   ;;  %s995_s28 = smov 96  }
   0xc   : > { %s950_s14 = smul.u32 6, %s1130_s13  ;;  %vm426_vm6 = vcmask 130048   ;;  %vm560_vm7 = vcmask 146432   ;;  %vm637_vm8 = vcmask 261120   ;;  %vm771_vm9 = vcmask 277504   ;;  %s996_s29 = smov 95  }
   0xd   : > { %v173_v1 = vand.u32 127, %v172_v0  ;;  %s997_s30 = smov 94   ;;  %vm262_vm10 = vcmask 1039360   ;;  %vm269_vm11 = vcmask 1041408   ;;  %vm265_vm12 = vcmask 31744  }
   0xe   : > { %s1033_s17 = scalar_lea.vmem %s1125_s0, %s950_s14  ;;  %vm380_vm13 = vcmask 1031168   ;;  %vm457_vm14 = vcmask 916480   ;;  %vm514_vm15 = vcmask 908288  }
   0xf   : > { %v174_v2 = vadd.s32 128, %v173_v1  ;;  %v179_v3 = vand.u32 15, %v173_v1  ;;  %v225_v9 = vld [vmem:[%s1033_s17] sm:$0xf] }
  0x10   : > { %v226_v15 = vunpack.c.l.bf16 %v225_v9  ;;  %v245_v21 = vld [vmem:[%s1033_s17] sm:$0x3f] }
  0x11   : > { %v186_v4 = vand.u32 15, %v174_v2  ;;  %v212_v5 = vadd.s32 1, %v179_v3  ;;  %v199_v6 = vadd.s32 4294967295, %v179_v3  ;;  %v337_v27 = vld [vmem:[%s1033_s17] sm:$0x3f] }
  0x12   : > { %v339_v28 = vunpack.c.h.bf16 %v337_v27  ;;  %v338_v30 = vunpack.c.l.bf16 %v337_v27  ;;  %v420_v35 = vld [vmem:[%s1033_s17] sm:$0x3f] }
  0x13   : > { %v213_v7 = vadd.s32 1, %v186_v4  ;;  %vm216_vm0 = vcmp.lt.s32.totalorder %v212_v5, 16  ;;  %v200_v8 = vadd.s32 4294967295, %v186_v4  ;;  %vm201_vm1 = vcmp.ge.s32.totalorder %v199_v6, 0  ;;  %v497_v49 = vld [vmem:[%s1033_s17] sm:$0x3f] }
  0x14   : > { %v919_v11 = vsel %vm216_vm0, 1.0, %v984_v10  ;;  %v917_v13 = vsel %vm201_vm1, 1.0, %v984_v10  ;;  %v422_v36 = vunpack.c.h.bf16 %v420_v35  ;;  %v421_v38 = vunpack.c.l.bf16 %v420_v35  ;;  %v554_v51 = vld [vmem:[%s1033_s17] sm:$0x3f] }
  0x15   : > { %vm217_vm2 = vcmp.lt.s32.totalorder %v213_v7, 16  ;;  %vm202_vm4 = vcmp.ge.s32.totalorder %v200_v8, 0  ;;  %v556_v56 = vunpack.c.h.bf16 %v554_v51  ;;  %v555_v60 = vunpack.c.l.bf16 %v554_v51  ;;  %v631_v63 = vld [vmem:[%s1033_s17] sm:$0x3f] }
  0x16   : > { %v920_v12 = vsel %vm217_vm2, 1.0, %v984_v10  ;;  %v918_v14 = vsel %vm202_vm4, 1.0, %v984_v10  ;;  %v633_v4 = vunpack.c.h.bf16 %v631_v63  ;;  %v632_v7 = vunpack.c.l.bf16 %v631_v63 }
  0x17   : > { %v344_v16 = vrot.slane %v920_v12, 4  ;;  %v231_v17 = vrot.slane %v918_v14, 4  ;;  %vm591_vm0 = vcmask 900096   ;;  %vm668_vm1 = vcmask 785408  }
  0x18   : > { %vm725_vm2 = vcmask 777216  }
  0x19   : > { %v345_v18 = vsel %vm232_vm3, %v919_v11, %v344_v16  ;;  %v233_v19 = vsel %vm232_vm3, %v917_v13, %v231_v17  ;;  %v708_v17 = vld [vmem:[%s1033_s17] sm:$0x3f]  ;;  %vm802_vm3 = vcmask 769024  }
  0x1a   : > { %346 = vrot.lane.b32.xlu0 %v345_v18, %s985_s18  ;;  %v235_v20 = vmul.f32 %v233_v19, %v226_v15  ;;  %557 = vrot.lane.b32.xlu1 %v345_v18, %s986_s19 }
  0x1c   : > { %237 = vst [vmem:[#allocation1] ss:$2 sm:$0xff] %v235_v20 }
  0x22   : > { %423 = vrot.lane.b32.xlu0 %v233_v19, %s987_s20  ;;  %634 = vrot.lane.b32.xlu1 %v233_v19, %s988_s21  ;;  %v765_v19 = vld [vmem:[%s1033_s17] sm:$0x3f] }
  0x23   : > { %v1037_v22 = vld.sshfl [vmem:[#allocation1] sm:$0xff pattern:$0x75316420]  ;;  %v1039_v23 = vld.sshfl [vmem:[#allocation1 + $0x8] sm:$0xff pattern:$0x75316420] }
  0x24   : > { %249 = vst [vmem:[#allocation1] ss:$4 sm:$0xff] %v245_v21  ;;  %v243_v51 = vpack.c.bf16 %v1039_v23, %v1039_v23 }
  0x2a   : > { %768 = vrot.lane.b32.xlu1 %v345_v18, %s989_s22 }
  0x2b   : > { %v254_v24 = vld.sshfl [vmem:[#allocation1 + $0x10] sm:$0xff pattern:$0x73625140]  ;;  %v250_v25 = vld.sshfl [vmem:[#allocation1] sm:$0xff pattern:$0x73625140] }
  0x2c   : > { %260 = vrot.lane.b32.xlu0 %v254_v24, %s990_s23  ;;  %256 = vrot.lane.b32.xlu2 %v250_v25, %s990_s23  ;;  %v252_v26 = vld.sshfl [vmem:[#allocation1 + $0x8] sm:$0xff pattern:$0x73625140] }
  0x34   : > { %258 = vrot.lane.b32.xlu2 %v252_v26, %s990_s23  ;;  %v767_v26 = vunpack.c.h.bf16 %v765_v19 }
  0x8c   : > { %v347_v29 = vpop.permute.xlu0 %346  ;;  %v558_v50 = vpop.permute.xlu1 %557 }
  0x8d   : > { %v348_v31 = vrot.slane %v347_v29, 4  ;;  %v559_v57 = vrot.slane %v558_v50, 4 }
  0x8f   : > { %v350_v32 = vsel %vm349_vm5, %v348_v31, %v347_v29  ;;  %v354_v33 = vmul.f32 %v348_v31, %v339_v28  ;;  %v561_v61 = vsel %vm560_vm7, %v559_v57, %v558_v50  ;;  %v565_v62 = vmul.f32 %v559_v57, %v556_v56 }
  0x90   : > { %v353_v34 = vmul.f32 %v350_v32, %v338_v30  ;;  %v564_v1 = vmul.f32 %v561_v61, %v555_v60  ;;  %v766_v30 = vunpack.c.l.bf16 %v765_v19  ;;  %v242_v50 = vpack.c.bf16 %v1037_v22, %v1037_v22  ;;  %v244_v22 = vld [vmem:[%s1126_s1] sm:$0xf] }
  0x91   : > { %359 = vst [vmem:[#allocation1 + $0x10] ss:$2 sm:$0xff] %v354_v33 }
  0x92   : > { %357 = vst [vmem:[#allocation1] ss:$2 sm:$0xff] %v353_v34 }
  0x94   : > { %v424_v37 = vpop.permute.xlu0 %423  ;;  %v635_v0 = vpop.permute.xlu1 %634 }
  0x95   : > { %v425_v39 = vrot.slane %v424_v37, 4  ;;  %v636_v6 = vrot.slane %v635_v0, 4 }
  0x97   : > { %v427_v40 = vsel %vm426_vm6, %v425_v39, %v424_v37  ;;  %v431_v41 = vmul.f32 %v425_v39, %v422_v36  ;;  %v642_v8 = vmul.f32 %v636_v6, %v633_v4  ;;  %v638_v9 = vsel %vm637_vm8, %v636_v6, %v635_v0  ;;  %v929_v6 = vld [vmem:[%s1126_s1 + $0xc] sm:$0xf] }
  0x98   : > { %v362_v42 = vld.sshfl [vmem:[#allocation1 + $0x10] sm:$0xff pattern:$0x75316420]  ;;  %v430_v43 = vmul.f32 %v427_v40, %v421_v38  ;;  %v641_v11 = vmul.f32 %v638_v9, %v632_v7 }
  0x99   : > { %436 = vst [vmem:[#allocation1 + $0x10] ss:$2 sm:$0xff] %v431_v41  ;;  %v368_v44 = vpack.c.bf16 %v362_v42, %v362_v42  ;;  %v361_v45 = vld.sshfl [vmem:[#allocation1 + $0x8] sm:$0xff pattern:$0x75316420] }
  0x9a   : > { %v367_v46 = vpack.c.bf16 %v361_v45, %v361_v45  ;;  %v360_v47 = vld.sshfl [vmem:[#allocation1] sm:$0xff pattern:$0x75316420] }
  0x9b   : > { %378 = vrot.lane.b32.xlu1 %v368_v44, %s991_s24  ;;  %v366_v48 = vpack.c.bf16 %v360_v47, %v360_v47  ;;  %434 = vst [vmem:[#allocation1] ss:$2 sm:$0xff] %v430_v43  ;;  %v257_v43 = vpop.permute.xlu2 %256 }
  0x9c   : > { %376 = vrot.lane.b32.xlu0 %v367_v46, %s991_s24  ;;  %v769_v18 = vpop.permute.xlu1 %768 }
  0x9d   : > { %374 = vrot.lane.b32.xlu2 %v366_v48, %s991_s24  ;;  %v770_v27 = vrot.slane %v769_v18, 4 }
  0x9e   : > { %v261_v44 = vpop.permute.xlu0 %260 }
  0x9f   : > { %v772_v31 = vsel %vm771_vm9, %v770_v27, %v769_v18  ;;  %v776_v32 = vmul.f32 %v770_v27, %v767_v26 }
  0xa0   : > { %v439_v52 = vld.sshfl [vmem:[#allocation1 + $0x10] sm:$0xff pattern:$0x75316420]  ;;  %v775_v33 = vmul.f32 %v772_v31, %v766_v30 }
  0xa1   : > { %v445_v53 = vpack.c.bf16 %v439_v52, %v439_v52  ;;  %v306_v52 = vsel %vm269_vm11, %v242_v50, 0 }
  0xa2   : > { %v438_v54 = vld.sshfl [vmem:[#allocation1 + $0x8] sm:$0xff pattern:$0x75316420]  ;;  %v437_v55 = vld.sshfl [vmem:[#allocation1] sm:$0xff pattern:$0x75316420]  ;;  %318 = vmatpush.bf16.msra.mxu2 %v306_v52 }
  0xa3   : > { %455 = vrot.lane.b32.xlu1 %v445_v53, %s992_s25  ;;  %v444_v58 = vpack.c.bf16 %v438_v54, %v438_v54  ;;  %v443_v59 = vpack.c.bf16 %v437_v55, %v437_v55  ;;  %501 = vst [vmem:[#allocation1] ss:$4 sm:$0xff] %v497_v49  ;;  %v259_v45 = vpop.permute.xlu2 %258  ;;  %v309_v53 = vsel %vm269_vm11, %v243_v51, 0  ;;  %v921_v54 = vld [vmem:[%s1126_s1 + $0x4] sm:$0xf] }
  0xa4   : > { %v263_v46 = vsel %vm262_vm10, %v257_v43, %v259_v45  ;;  %v264_v47 = vsel %vm262_vm10, %v259_v45, %v261_v44  ;;  %331 = vmatpush.bf16.msra.mxu3 %v309_v53 }
  0xa5   : > { %453 = vrot.lane.b32.xlu0 %v444_v58, %s992_s25  ;;  %451 = vrot.lane.b32.xlu2 %v443_v59, %s992_s25  ;;  %v271_v48 = vsel %vm269_vm11, %v263_v46, 0  ;;  %v274_v49 = vsel %vm269_vm11, %v264_v47, 0 }
  0xa6   : > { %283 = vmatpush.bf16.msra.mxu0 %v271_v48  ;;  %296 = vmatpush.bf16.msra.mxu1 %v274_v49  ;;  %v944_v49 = vld [vmem:[%s1126_s1 + $0x20] sm:$0xf] }
  0xa7   : > { %924 = vmatmul.msk.bf16.vlgmr.msra.gmra.mxu2 %vm265_vm12, %v244_v22  ;;  %925 = vmatmul.msk.bf16.vlgmr.msra.gmra.mxu3 %vm265_vm12, %v244_v22 }
  0xa9   : > { %922 = vmatmul.msk.bf16.vlgmr.msra.gmra.mxu0 %vm265_vm12, %v921_v54  ;;  %923 = vmatmul.msk.bf16.vlgmr.msra.gmra.mxu1 %vm265_vm12, %v921_v54 }
  0xaa   : > { %v506_v2 = vld.sshfl [vmem:[#allocation1 + $0x10] sm:$0xff pattern:$0x73625140]  ;;  %v504_v3 = vld.sshfl [vmem:[#allocation1 + $0x8] sm:$0xff pattern:$0x73625140] }
  0xab   : > { %512 = vrot.lane.b32.xlu1 %v506_v2, %s993_s26  ;;  %570 = vst [vmem:[#allocation1 + $0x10] ss:$2 sm:$0xff] %v565_v62  ;;  %v502_v5 = vld.sshfl [vmem:[#allocation1] sm:$0xff pattern:$0x73625140] }
  0xac   : > { %568 = vst [vmem:[#allocation1] ss:$2 sm:$0xff] %v564_v1  ;;  %v926_v62 = vld [vmem:[%s1126_s1 + $0x8] sm:$0xf] }
  0xad   : > { %510 = vrot.lane.b32.xlu0 %v504_v3, %s993_s26  ;;  %508 = vrot.lane.b32.xlu2 %v502_v5, %s993_s26  ;;  %s949_s26 = sshll.u32 %s1130_s13, 4 }
  0xb2   : > { %v573_v10 = vld.sshfl [vmem:[#allocation1 + $0x10] sm:$0xff pattern:$0x75316420] }
  0xb3   : > { %v579_v12 = vpack.c.bf16 %v573_v10, %v573_v10  ;;  %647 = vst [vmem:[#allocation1 + $0x10] ss:$2 sm:$0xff] %v642_v8  ;;  %v572_v13 = vld.sshfl [vmem:[#allocation1 + $0x8] sm:$0xff pattern:$0x75316420] }
  0xb4   : > { %v578_v14 = vpack.c.bf16 %v572_v13, %v572_v13  ;;  %v571_v15 = vld.sshfl [vmem:[#allocation1] sm:$0xff pattern:$0x75316420]  ;;  %v932_v13 = vld [vmem:[%s1126_s1 + $0x10] sm:$0xf] }
  0xb5   : > { %589 = vrot.lane.b32.xlu1 %v579_v12, %s994_s27  ;;  %v577_v16 = vpack.c.bf16 %v571_v15, %v571_v15  ;;  %645 = vst [vmem:[#allocation1] ss:$2 sm:$0xff] %v641_v11 }
  0xb6   : > { %587 = vrot.lane.b32.xlu0 %v578_v14, %s994_s27 }
  0xb7   : > { %585 = vrot.lane.b32.xlu2 %v577_v16, %s994_s27 }
  0xba   : > { %v650_v20 = vld.sshfl [vmem:[#allocation1 + $0x10] sm:$0xff pattern:$0x75316420] }
  0xbb   : > { %v656_v21 = vpack.c.bf16 %v650_v20, %v650_v20  ;;  %v998_v20 = vmov 0  }
  0xbc   : > { %v649_v24 = vld.sshfl [vmem:[#allocation1 + $0x8] sm:$0xff pattern:$0x75316420]  ;;  %v648_v25 = vld.sshfl [vmem:[#allocation1] sm:$0xff pattern:$0x75316420]  ;;  %974 = vset.pattern.permute.xlu2 %v998_v20  ;;  %975 = vset.pattern.permute.xlu0 %v998_v20 }
  0xbd   : > { %666 = vrot.lane.b32.xlu1 %v656_v21, %s995_s28  ;;  %v655_v28 = vpack.c.bf16 %v649_v24, %v649_v24  ;;  %v654_v29 = vpack.c.bf16 %v648_v25, %v648_v25  ;;  %712 = vst [vmem:[#allocation1] ss:$4 sm:$0xff] %v708_v17  ;;  %v842_v17 = vld [vmem:[%s1127_s2] sm:$0xff]  ;;  %v935_v25 = vld [vmem:[%s1126_s1 + $0x14] sm:$0xf] }
  0xbf   : > { %664 = vrot.lane.b32.xlu0 %v655_v28, %s995_s28  ;;  %662 = vrot.lane.b32.xlu2 %v654_v29, %s995_s28 }
  0xc4   : > { %v717_v34 = vld.sshfl [vmem:[#allocation1 + $0x10] sm:$0xff pattern:$0x73625140]  ;;  %v715_v35 = vld.sshfl [vmem:[#allocation1 + $0x8] sm:$0xff pattern:$0x73625140] }
  0xc5   : > { %723 = vrot.lane.b32.xlu1 %v717_v34, %s996_s29  ;;  %781 = vst [vmem:[#allocation1 + $0x10] ss:$2 sm:$0xff] %v776_v32  ;;  %v713_v36 = vld.sshfl [vmem:[#allocation1] sm:$0xff pattern:$0x73625140] }
  0xc6   : > { %779 = vst [vmem:[#allocation1] ss:$2 sm:$0xff] %v775_v33  ;;  %v938_v33 = vld [vmem:[%s1126_s1 + $0x18] sm:$0xf] }
  0xc7   : > { %721 = vrot.lane.b32.xlu0 %v715_v35, %s996_s29  ;;  %719 = vrot.lane.b32.xlu2 %v713_v36, %s996_s29  ;;  %s170_s29 = scalar_lea.vmem %s1128_s3, %s949_s26 }
  0xcc   : > { %v784_v37 = vld.sshfl [vmem:[#allocation1 + $0x10] sm:$0xff pattern:$0x75316420] }
  0xcd   : > { %v790_v38 = vpack.c.bf16 %v784_v37, %v784_v37  ;;  %v783_v39 = vld.sshfl [vmem:[#allocation1 + $0x8] sm:$0xff pattern:$0x75316420]  ;;  %v782_v40 = vld.sshfl [vmem:[#allocation1] sm:$0xff pattern:$0x75316420] }
  0xce   : > { %v789_v41 = vpack.c.bf16 %v783_v39, %v783_v39  ;;  %v788_v42 = vpack.c.bf16 %v782_v40, %v782_v40 }
  0xcf   : > { %800 = vrot.lane.b32.xlu1 %v790_v38, %s997_s30 }
  0xd0   : > { %798 = vrot.lane.b32.xlu0 %v789_v41, %s997_s30  ;;  %796 = vrot.lane.b32.xlu2 %v788_v42, %s997_s30  ;;  %v941_v41 = vld [vmem:[%s1126_s1 + $0x1c] sm:$0xf] }
  0xd8   : > { %845 = vperm.xlu2 %974, %v842_v17  }
  0xf7   : > { %v375_v23 = vpop.permute.xlu2 %374 }
  0xff   : > { %v452_v59 = vpop.permute.xlu2 %451 }
 0x107   : > { %v509_v5 = vpop.permute.xlu2 %508 }
 0x10d   : > { %v379_v55 = vpop.permute.xlu1 %378 }
 0x10e   : > { %v377_v56 = vpop.permute.xlu0 %376 }
 0x10f   : > { %v381_v57 = vsel %vm380_vm13, %v375_v23, %v377_v56  ;;  %v382_v58 = vsel %vm380_vm13, %v377_v56, %v379_v55 }
 0x110   : > { %v387_v60 = vsel %vm269_vm11, %v381_v57, 0  ;;  %v390_v61 = vsel %vm269_vm11, %v382_v58, 0 }
 0x111   : > { %399 = vmatpush.bf16.msrb.mxu0 %v387_v60  ;;  %412 = vmatpush.bf16.msrb.mxu1 %v390_v61  ;;  %v586_v14 = vpop.permute.xlu2 %585 }
 0x114   : > { %927 = vmatmul.msk.bf16.vlgmr.msrb.gmra.mxu0 %vm265_vm12, %v926_v62  ;;  %928 = vmatmul.msk.bf16.vlgmr.msrb.gmra.mxu1 %vm265_vm12, %v926_v62 }
 0x115   : > { %v456_v63 = vpop.permute.xlu1 %455 }
 0x117   : > { %v454_v0 = vpop.permute.xlu0 %453 }
 0x118   : > { %v458_v1 = vsel %vm457_vm14, %v452_v59, %v454_v0  ;;  %v459_v2 = vsel %vm457_vm14, %v454_v0, %v456_v63 }
 0x119   : > { %v464_v3 = vsel %vm269_vm11, %v458_v1, 0  ;;  %v467_v4 = vsel %vm269_vm11, %v459_v2, 0  ;;  %v663_v26 = vpop.permute.xlu2 %662 }
 0x11a   : > { %476 = vmatpush.bf16.msrb.mxu2 %v464_v3  ;;  %489 = vmatpush.bf16.msrb.mxu3 %v467_v4 }
 0x11d   : > { %930 = vmatmul.msk.bf16.vlgmr.msrb.gmra.mxu2 %vm265_vm12, %v929_v6  ;;  %931 = vmatmul.msk.bf16.vlgmr.msrb.gmra.mxu3 %vm265_vm12, %v929_v6  ;;  %v513_v7 = vpop.permute.xlu1 %512 }
 0x11f   : > { %v511_v8 = vpop.permute.xlu0 %510 }
 0x120   : > { %v515_v9 = vsel %vm514_vm15, %v509_v5, %v511_v8  ;;  %v516_v10 = vsel %vm514_vm15, %v511_v8, %v513_v7 }
 0x121   : > { %v521_v11 = vsel %vm269_vm11, %v515_v9, 0  ;;  %v524_v12 = vsel %vm269_vm11, %v516_v10, 0  ;;  %v720_v35 = vpop.permute.xlu2 %719 }
 0x122   : > { %533 = vmatpush.bf16.msra.mxu0 %v521_v11  ;;  %546 = vmatpush.bf16.msra.mxu1 %v524_v12 }
 0x125   : > { %933 = vmatmul.msk.bf16.vlgmr.msra.gmra.mxu0 %vm265_vm12, %v932_v13  ;;  %934 = vmatmul.msk.bf16.vlgmr.msra.gmra.mxu1 %vm265_vm12, %v932_v13 }
 0x126   : > { %v285_v50 = vpop.f32.mrf.mxu0  ;;  %v298_v51 = vpop.f32.mrf.mxu1 }
 0x127   : > { %v590_v15 = vpop.permute.xlu1 %589 }
 0x128   : > { %v588_v16 = vpop.permute.xlu0 %587 }
 0x129   : > { %v592_v18 = vsel %vm591_vm0, %v586_v14, %v588_v16  ;;  %v593_v19 = vsel %vm591_vm0, %v588_v16, %v590_v15 }
 0x12a   : > { %v598_v21 = vsel %vm269_vm11, %v592_v18, 0  ;;  %v601_v24 = vsel %vm269_vm11, %v593_v19, 0  ;;  %v797_v43 = vpop.permute.xlu2 %796  ;;  %v320_v54 = vpop.f32.mrf.mxu2 }
 0x12b   : > { %610 = vmatpush.bf16.msra.mxu2 %v598_v21  ;;  %623 = vmatpush.bf16.msra.mxu3 %v601_v24  ;;  %v333_v22 = vpop.f32.mrf.mxu3  ;;  %v321_v23 = vadd.f32 %v320_v54, %v285_v50 }
 0x12c   : > { %v334_v55 = vadd.f32 %v333_v22, %v298_v51 }
 0x12e   : > { %936 = vmatmul.msk.bf16.vlgmr.msra.gmra.mxu2 %vm265_vm12, %v935_v25  ;;  %937 = vmatmul.msk.bf16.vlgmr.msra.gmra.mxu3 %vm265_vm12, %v935_v25  ;;  %v287_v52 = vpop.f32.mrf.mxu0  ;;  %v300_v53 = vpop.f32.mrf.mxu1 }
 0x12f   : > { %v667_v27 = vpop.permute.xlu1 %666 }
 0x131   : > { %v665_v28 = vpop.permute.xlu0 %664 }
 0x132   : > { %v669_v29 = vsel %vm668_vm1, %v663_v26, %v665_v28  ;;  %v670_v30 = vsel %vm668_vm1, %v665_v28, %v667_v27  ;;  %v322_v56 = vpop.f32.mrf.mxu2 }
 0x133   : > { %v675_v31 = vsel %vm269_vm11, %v669_v29, 0  ;;  %v678_v32 = vsel %vm269_vm11, %v670_v30, 0  ;;  %v335_v57 = vpop.f32.mrf.mxu3  ;;  %v846_v30 = vpop.permute.xlu2 %845 }
 0x134   : > { %687 = vmatpush.bf16.msrb.mxu0 %v675_v31  ;;  %700 = vmatpush.bf16.msrb.mxu1 %v678_v32 }
 0x137   : > { %939 = vmatmul.msk.bf16.vlgmr.msrb.gmra.mxu0 %vm265_vm12, %v938_v33  ;;  %940 = vmatmul.msk.bf16.vlgmr.msrb.gmra.mxu1 %vm265_vm12, %v938_v33  ;;  %v724_v34 = vpop.permute.xlu1 %723 }
 0x139   : > { %v722_v36 = vpop.permute.xlu0 %721 }
 0x13a   : > { %v726_v37 = vsel %vm725_vm2, %v720_v35, %v722_v36  ;;  %v727_v38 = vsel %vm725_vm2, %v722_v36, %v724_v34 }
 0x13b   : > { %v732_v39 = vsel %vm269_vm11, %v726_v37, 0  ;;  %v735_v40 = vsel %vm269_vm11, %v727_v38, 0 }
 0x13c   : > { %744 = vmatpush.bf16.msrb.mxu2 %v732_v39  ;;  %757 = vmatpush.bf16.msrb.mxu3 %v735_v40 }
 0x13f   : > { %942 = vmatmul.msk.bf16.vlgmr.msrb.gmra.mxu2 %vm265_vm12, %v941_v41  ;;  %943 = vmatmul.msk.bf16.vlgmr.msrb.gmra.mxu3 %vm265_vm12, %v941_v41 }
 0x141   : > { %v801_v42 = vpop.permute.xlu1 %800 }
 0x142   : > { %v799_v44 = vpop.permute.xlu0 %798 }
 0x143   : > { %v803_v45 = vsel %vm802_vm3, %v797_v43, %v799_v44  ;;  %v804_v46 = vsel %vm802_vm3, %v799_v44, %v801_v42 }
 0x144   : > { %v809_v47 = vsel %vm269_vm11, %v803_v45, 0  ;;  %v812_v48 = vsel %vm269_vm11, %v804_v46, 0 }
 0x145   : > { %821 = vmatpush.bf16.msra.mxu0 %v809_v47  ;;  %834 = vmatpush.bf16.msra.mxu1 %v812_v48 }
 0x148   : > { %945 = vmatmul.msk.bf16.vlgmr.msra.gmra.mxu0 %vm265_vm12, %v944_v49  ;;  %946 = vmatmul.msk.bf16.vlgmr.msra.gmra.mxu1 %vm265_vm12, %v944_v49 }
 0x191   : > { %v401_v58 = vpop.f32.mrf.mxu0  ;;  %v414_v59 = vpop.f32.mrf.mxu1 }
 0x192   : > { %v418_v10 = vadd.f32 %v401_v58, %v321_v23  ;;  %v419_v11 = vadd.f32 %v414_v59, %v334_v55 }
 0x199   : > { %v403_v60 = vpop.f32.mrf.mxu0  ;;  %v416_v61 = vpop.f32.mrf.mxu1 }
 0x1a0   : > { %v478_v62 = vpop.f32.mrf.mxu2  ;;  %v491_v63 = vpop.f32.mrf.mxu3 }
 0x1a1   : > { %v495_v12 = vadd.f32 %v478_v62, %v418_v10  ;;  %v496_v13 = vadd.f32 %v491_v63, %v419_v11 }
 0x1a2   : > { %v535_v0 = vpop.f32.mrf.mxu0  ;;  %v548_v1 = vpop.f32.mrf.mxu1 }
 0x1a3   : > { %v552_v16 = vadd.f32 %v535_v0, %v495_v12  ;;  %v553_v17 = vadd.f32 %v548_v1, %v496_v13 }
 0x1a8   : > { %v480_v2 = vpop.f32.mrf.mxu2  ;;  %v493_v3 = vpop.f32.mrf.mxu3 }
 0x1aa   : > { %v537_v4 = vpop.f32.mrf.mxu0  ;;  %v550_v5 = vpop.f32.mrf.mxu1 }
 0x1b1   : > { %v612_v6 = vpop.f32.mrf.mxu2  ;;  %v625_v7 = vpop.f32.mrf.mxu3 }
 0x1b2   : > { %v629_v20 = vadd.f32 %v612_v6, %v552_v16  ;;  %v630_v21 = vadd.f32 %v625_v7, %v553_v17 }
 0x1b4   : > { %v689_v8 = vpop.f32.mrf.mxu0  ;;  %v702_v9 = vpop.f32.mrf.mxu1 }
 0x1b5   : > { %v706_v24 = vadd.f32 %v689_v8, %v629_v20  ;;  %v707_v25 = vadd.f32 %v702_v9, %v630_v21 }
 0x1b9   : > { %v614_v14 = vpop.f32.mrf.mxu2  ;;  %v627_v15 = vpop.f32.mrf.mxu3 }
 0x1bc   : > { %v691_v18 = vpop.f32.mrf.mxu0  ;;  %v704_v19 = vpop.f32.mrf.mxu1 }
 0x1c2   : > { %v746_v26 = vpop.f32.mrf.mxu2  ;;  %v759_v27 = vpop.f32.mrf.mxu3 }
 0x1c3   : > { %v763_v28 = vadd.f32 %v746_v26, %v706_v24  ;;  %v764_v29 = vadd.f32 %v759_v27, %v707_v25 }
 0x1c5   : > { %v823_v31 = vpop.f32.mrf.mxu0  ;;  %v836_v32 = vpop.f32.mrf.mxu1 }
 0x1c6   : > { %v840_v33 = vadd.f32 %v823_v31, %v763_v28  ;;  %v841_v34 = vadd.f32 %v836_v32, %v764_v29 }
 0x1c8   : > { %v848_v35 = vadd.f32 %v846_v30, %v840_v33  ;;  %v849_v36 = vadd.f32 %v846_v30, %v841_v34 }
 0x1ca   : > { %v850_v37 = vmax.f32 %v848_v35, 0.0  ;;  %v851_v38 = vmax.f32 %v849_v36, 0.0  ;;  %v748_v39 = vpop.f32.mrf.mxu2  ;;  %v761_v40 = vpop.f32.mrf.mxu3 }
 0x1cc   : > { %852 = vst [vmem:[%s170_s29] sm:$0xff] %v850_v37 }
 0x1cd   : > { %853 = vst [vmem:[%s170_s29 + $0x8] sm:$0xff] %v851_v38  ;;  %v825_v41 = vpop.f32.mrf.mxu0  ;;  %v838_v42 = vpop.f32.mrf.mxu1 }
 0x1ce PF: > { %s13_s12 = sadd.s32 1, %s982_s12  }
 0x1cf   : > { %p10_p4 = scmp.ge.s32.totalorder %s13_s12, 4  }
 0x1d1   :  { %12 = sbr.rel (!%p10_p4) target bundleno = 1 (0x1), region = 75 }

</bundles_post_ra>
